<compile_context>
chip_gen: v5e
topology: v5e:2x2
jax: 0.10.0
libtpu: 0.0.40
codegen_flags: <defaults>
</compile_context>

<pallas_src>
import functools

import jax
import jax.numpy as jnp
from jax.experimental import pallas as pl
from jax.experimental.pallas import tpu as pltpu


def _round_up(x, m):
    return ((x + m - 1) // m) * m


def _choose_tm(M, tile_m):
    """M-tile size: multiple of 8, prefer >=2 tiles (megacore) when M allows."""
    tm = min(tile_m, _round_up(M, 8))
    if _round_up(M, tm) // tm < 2 and M > 8:
        tm = _round_up((M + 1) // 2, 8)
    return tm


def _divisor_tile(Mp, target):
    """Largest multiple-of-8 divisor of Mp <= target, preferring >=2 tiles."""
    t = min(target, Mp)
    t -= t % 8
    t = max(t, 8)
    while t > 8 and Mp % t != 0:
        t -= 8
    if Mp // t < 2 and Mp > 8:
        return _divisor_tile(Mp, max(Mp // 2, 8))
    return t


# ----------------------------------------------------------------------------
# Pallas kernels
# ----------------------------------------------------------------------------
def _mm_bias_kernel(a_ref, w_ref, b_ref, o_ref):
    acc = jnp.dot(a_ref[...], w_ref[...], preferred_element_type=jnp.float32)
    o_ref[...] = (acc + b_ref[...]).astype(o_ref.dtype)


def _cmm_bias_kernel(ar_ref, ai_ref, wt_ref, wb_ref, b_ref, o_ref):
    acc = (jnp.dot(ar_ref[...], wt_ref[...], preferred_element_type=jnp.float32)
           + jnp.dot(ai_ref[...], wb_ref[...], preferred_element_type=jnp.float32)
           + b_ref[...])
    o_ref[...] = acc.astype(o_ref.dtype)


def _bn_stats_kernel(x_ref, sum_ref, sq_ref, *, m_logical, tm):
    @pl.when(pl.program_id(0) == 0)
    def _():
        sum_ref[...] = jnp.zeros_like(sum_ref)
        sq_ref[...] = jnp.zeros_like(sq_ref)

    x = x_ref[...].astype(jnp.float32)
    rows = (jax.lax.broadcasted_iota(jnp.int32, (x.shape[0], 1), 0)
            + pl.program_id(0) * tm)
    x = jnp.where(rows < m_logical, x, 0.0)        # exclude padded rows from stats
    sum_ref[...] += jnp.sum(x, axis=0, keepdims=True)
    sq_ref[...] += jnp.sum(x * x, axis=0, keepdims=True)


def _bn_apply_kernel(x_ref, sum_ref, sq_ref, g_ref, b_ref, a_ref, o_ref, *,
                     count, eps):
    x = x_ref[...].astype(jnp.float32)
    inv = 1.0 / count
    mean = sum_ref[...] * inv
    var = sq_ref[...] * inv - mean * mean
    y = (x - mean) * jax.lax.rsqrt(var + eps) * g_ref[...] + b_ref[...]
    o_ref[...] = jnp.where(y >= 0.0, y, a_ref[0, 0] * y).astype(o_ref.dtype)


def _lstm_rec_kernel(gx_ref, whh_ref, o_ref, h_sc, c_sc, *, hidden2, tb):
    """Fused (re,im) LSTM recurrence.  gx already holds x@W_ih + bias (bf16).

    Gate layout along the last axis: [i_re|i_im, f_re|f_im, g_re|g_im, o_re|o_im],
    state h/c is (Bc, 2H); W_hh is block-diagonal so re/im states stay separate.
    """
    @pl.when(pl.program_id(0) == 0)
    def _():
        h_sc[...] = jnp.zeros_like(h_sc)
        c_sc[...] = jnp.zeros_like(c_sc)

    h = h_sc[...]
    c = c_sc[...]
    whh = whh_ref[...]                                   # bf16
    for k in range(tb):                                  # static unroll
        gates = (gx_ref[k].astype(jnp.float32)
                 + jnp.dot(h.astype(jnp.bfloat16), whh,
                           preferred_element_type=jnp.float32))
        i = jax.nn.sigmoid(gates[:, 0 * hidden2:1 * hidden2])
        f = jax.nn.sigmoid(gates[:, 1 * hidden2:2 * hidden2])
        g = jnp.tanh(gates[:, 2 * hidden2:3 * hidden2])
        o = jax.nn.sigmoid(gates[:, 3 * hidden2:4 * hidden2])
        c = f * c + i * g
        h = o * jnp.tanh(c)
        o_ref[k] = h
    h_sc[...] = h
    c_sc[...] = c


# ----------------------------------------------------------------------------
# Packed-weight matmul wrappers
# ----------------------------------------------------------------------------
def pack_dense(w, b):
    """w: (K, N), b: (N,) -> padded bf16 weight + padded f32 bias row."""
    K, N = w.shape
    Kp, Np = _round_up(K, 128), _round_up(N, 128)
    w_p = jnp.pad(w.astype(jnp.bfloat16), ((0, Kp - K), (0, Np - N)))
    b_p = jnp.pad(b.astype(jnp.float32).reshape(1, N), ((0, 0), (0, Np - N)))
    return dict(w=w_p, b=b_p, K=K, N=N)


def pack_two_dense(w_top, w_bot, b):
    """Two-dot (block-complex) weight pack: o = pr@w_top + pi@w_bot + b."""
    K, N = w_top.shape
    Kp, Np = _round_up(K, 128), _round_up(N, 128)

    def pad2(z):
        return jnp.pad(z.astype(jnp.bfloat16), ((0, Kp - K), (0, Np - N)))

    b_p = jnp.pad(b.astype(jnp.float32).reshape(1, N), ((0, 0), (0, Np - N)))
    return dict(wt=pad2(w_top), wb=pad2(w_bot), b=b_p, K=K, N=N)


def _pad_act(a, Mp, Kp):
    M, K = a.shape
    a = a.astype(jnp.bfloat16)                  # cast first, pad after (bf16 pad)
    if (Mp, Kp) != (M, K):
        a = jnp.pad(a, ((0, Mp - M), (0, Kp - K)))
    return a


def matmul_bias_slab(a, packed, tile_m=512, out_dtype=jnp.bfloat16):
    M, _ = a.shape
    Kp, Np = packed["w"].shape
    tm = _choose_tm(M, tile_m)
    Mp = _round_up(M, tm)
    return pl.pallas_call(
        _mm_bias_kernel,
        out_shape=jax.ShapeDtypeStruct((Mp, Np), out_dtype),
        grid=(Mp // tm,),
        in_specs=[pl.BlockSpec((tm, Kp), lambda i: (i, 0)),
                  pl.BlockSpec((Kp, Np), lambda i: (0, 0)),
                  pl.BlockSpec((1, Np), lambda i: (0, 0))],
        out_specs=pl.BlockSpec((tm, Np), lambda i: (i, 0)),
        compiler_params=pltpu.CompilerParams(dimension_semantics=("parallel",)),
    )(_pad_act(a, Mp, Kp), packed["w"], packed["b"])


def matmul_bias(a, packed, tile_m=512, out_dtype=jnp.bfloat16):
    out = matmul_bias_slab(a, packed, tile_m, out_dtype)
    return out[:a.shape[0], :packed["N"]]


def complex_matmul_bias_slab(pr, pi, packed, tile_m=512, out_dtype=jnp.bfloat16):
    M, _ = pr.shape
    Kp, Np = packed["wt"].shape
    tm = _choose_tm(M, tile_m)
    Mp = _round_up(M, tm)
    return pl.pallas_call(
        _cmm_bias_kernel,
        out_shape=jax.ShapeDtypeStruct((Mp, Np), out_dtype),
        grid=(Mp // tm,),
        in_specs=[pl.BlockSpec((tm, Kp), lambda i: (i, 0)),
                  pl.BlockSpec((tm, Kp), lambda i: (i, 0)),
                  pl.BlockSpec((Kp, Np), lambda i: (0, 0)),
                  pl.BlockSpec((Kp, Np), lambda i: (0, 0)),
                  pl.BlockSpec((1, Np), lambda i: (0, 0))],
        out_specs=pl.BlockSpec((tm, Np), lambda i: (i, 0)),
        compiler_params=pltpu.CompilerParams(dimension_semantics=("parallel",)),
    )(_pad_act(pr, Mp, Kp), _pad_act(pi, Mp, Kp),
      packed["wt"], packed["wb"], packed["b"])


def complex_matmul_bias(pr, pi, packed, tile_m=512, out_dtype=jnp.bfloat16):
    out = complex_matmul_bias_slab(pr, pi, packed, tile_m, out_dtype)
    return out[:pr.shape[0], :packed["N"]]


# ----------------------------------------------------------------------------
# BatchNorm2d (train-mode stats) + PReLU, operating on lane-padded slabs
# ----------------------------------------------------------------------------
def bn_prelu_slab(x2, m_logical, gamma_p, beta_p, alpha, eps=1e-5, tile_m=1024):
    """x2: (Mp, Cp) bf16 slab; rows >= m_logical are excluded from the stats."""
    Mp, Cp = x2.shape
    tm = _divisor_tile(Mp, tile_m)
    grid = (Mp // tm,)

    s_sum, s_sq = pl.pallas_call(
        functools.partial(_bn_stats_kernel, m_logical=m_logical, tm=tm),
        out_shape=(jax.ShapeDtypeStruct((1, Cp), jnp.float32),
                   jax.ShapeDtypeStruct((1, Cp), jnp.float32)),
        grid=grid,
        in_specs=[pl.BlockSpec((tm, Cp), lambda i: (i, 0))],
        out_specs=(pl.BlockSpec((1, Cp), lambda i: (0, 0)),
                   pl.BlockSpec((1, Cp), lambda i: (0, 0))),
        compiler_params=pltpu.CompilerParams(dimension_semantics=("arbitrary",)),
    )(x2)

    return pl.pallas_call(
        functools.partial(_bn_apply_kernel, count=float(m_logical), eps=eps),
        out_shape=jax.ShapeDtypeStruct((Mp, Cp), jnp.bfloat16),
        grid=grid,
        in_specs=[pl.BlockSpec((tm, Cp), lambda i: (i, 0)),
                  pl.BlockSpec((1, Cp), lambda i: (0, 0)),
                  pl.BlockSpec((1, Cp), lambda i: (0, 0)),
                  pl.BlockSpec((1, Cp), lambda i: (0, 0)),
                  pl.BlockSpec((1, Cp), lambda i: (0, 0)),
                  pl.BlockSpec((1, 1), lambda i: (0, 0))],
        out_specs=pl.BlockSpec((tm, Cp), lambda i: (i, 0)),
        compiler_params=pltpu.CompilerParams(dimension_semantics=("parallel",)),
    )(x2, s_sum, s_sq, gamma_p, beta_p, alpha)


def bn_prelu_nhwc(x, gamma_p, beta_p, alpha, eps=1e-5, tile_m=1024):
    B, H, W, C = x.shape
    M = B * H * W
    Cp = gamma_p.shape[1]
    Mp = _round_up(M, 8)
    x2 = jnp.pad(x.reshape(M, C).astype(jnp.bfloat16),
                 ((0, Mp - M), (0, Cp - C)))
    y = bn_prelu_slab(x2, M, gamma_p, beta_p, alpha, eps, tile_m)
    return y[:M, :C].reshape(B, H, W, C)


def slab_to_nhwc(slab, B, H, W, N):
    M = B * H * W
    return slab[:M, :N].reshape(B, H, W, N)


# ----------------------------------------------------------------------------
# Complex conv / conv-transpose (im2col outside, block-complex matmul inside)
# ----------------------------------------------------------------------------
def _im2col_nhwc(x, kh, kw, sh, sw):
    B, H, W, C = x.shape
    Ho = (H - kh) // sh + 1
    Wo = (W - kw) // sw + 1
    cols = []
    for di in range(kh):
        for dj in range(kw):
            cols.append(x[:, di:di + sh * (Ho - 1) + 1:sh,
                             dj:dj + sw * (Wo - 1) + 1:sw, :])
    p = jnp.stack(cols, axis=3)                        # (B, Ho, Wo, kh*kw, C)
    return p.reshape(B * Ho * Wo, kh * kw * C), Ho, Wo


def _conv_w_to_mat(w):                                 # (Cout,Cin,kh,kw) -> (kh*kw*Cin,Cout)
    Cout = w.shape[0]
    return jnp.transpose(w, (2, 3, 1, 0)).reshape(-1, Cout)


def pack_complex_conv(wr, wi, br, bi):
    Wr, Wi = _conv_w_to_mat(wr), _conv_w_to_mat(wi)
    return pack_two_dense(jnp.concatenate([Wr, Wi], axis=1),
                          jnp.concatenate([-Wi, Wr], axis=1),
                          jnp.concatenate([br - bi, br + bi]))


def pack_complex_convT_phases(wr, wi, br, bi):
    """Phase-decompose ConvTranspose2d(k=(5,2), s=(2,1), p=(2,0), op=(1,0))."""
    assert wr.shape[2] == 5 and wr.shape[3] == 2, "phase pack assumes (5,2) kernel"

    def conv_w(w):                                     # flipped + in/out swapped
        return jnp.transpose(w[:, :, ::-1, ::-1], (1, 0, 2, 3))

    wcr, wci = conv_w(wr), conv_w(wi)
    bias = jnp.concatenate([br - bi, br + bi])

    def pack_phase(sl):
        Wr = _conv_w_to_mat(wcr[:, :, sl, :])
        Wi = _conv_w_to_mat(wci[:, :, sl, :])
        return pack_two_dense(jnp.concatenate([Wr, Wi], axis=1),
                              jnp.concatenate([-Wi, Wr], axis=1), bias)

    return pack_phase(slice(0, None, 2)), pack_phase(slice(1, None, 2))


def complex_conv2d_slab(x, packed, cin, kh, kw, stride, padding, tile_m=512):
    """x: (B,F,T,2*cin) NHWC; symmetric freq pad, causal (left-only) time pad."""
    sh, sw = stride
    ph, pw = padding
    xp = jnp.pad(x.astype(jnp.bfloat16), ((0, 0), (ph, ph), (pw, 0), (0, 0)))
    pr, Ho, Wo = _im2col_nhwc(xp[..., :cin], kh, kw, sh, sw)
    pi, _, _ = _im2col_nhwc(xp[..., cin:], kh, kw, sh, sw)
    slab = complex_matmul_bias_slab(pr, pi, packed, tile_m)
    return slab, (x.shape[0], Ho, Wo)


def complex_conv_transpose2d_phase(x, packed_even, packed_odd, cin, tile_m=512):
    """Even/odd output-row sub-convolutions (no zero-dilated intermediate)."""
    B, H, W, _ = x.shape
    x = x.astype(jnp.bfloat16)
    xr, xi = x[..., :cin], x[..., cin:]

    def pad_f(z, top):
        return jnp.pad(z, ((0, 0), (top, 1), (1, 1), (0, 0)))

    pr_e, Ho, Wo = _im2col_nhwc(pad_f(xr, 1), 3, 2, 1, 1)     # even rows: 3x2
    pi_e, _, _ = _im2col_nhwc(pad_f(xi, 1), 3, 2, 1, 1)
    pr_o, _, _ = _im2col_nhwc(pad_f(xr, 0), 2, 2, 1, 1)       # odd rows: 2x2
    pi_o, _, _ = _im2col_nhwc(pad_f(xi, 0), 2, 2, 1, 1)

    N = packed_even["N"]
    even = complex_matmul_bias(pr_e, pi_e, packed_even, tile_m).reshape(B, Ho, Wo, N)
    odd = complex_matmul_bias(pr_o, pi_o, packed_odd, tile_m).reshape(B, Ho, Wo, N)
    return jnp.stack([even, odd], axis=2).reshape(B, 2 * Ho, Wo, N)


# TODO(synk): skip_connect still concatenates in HBM; splitting the decoder
#   weight K-dim into dec/enc slices inside the kernel would remove it.
def skip_connect(dec, enc):
    dC = dec.shape[-1] // 2
    eC = enc.shape[-1] // 2
    return jnp.concatenate(
        [dec[..., :dC], enc[..., :eC], dec[..., dC:], enc[..., eC:]], axis=-1)


# ----------------------------------------------------------------------------
# Complex LSTM
# ----------------------------------------------------------------------------
def pack_complex_lstm(lstm_re, lstm_im):
    """Fuse re/im LSTM weights: gates [i_re|i_im, f_re|f_im, g_re|g_im, o_re|o_im]."""
    wih_r, whh_r, bih_r, bhh_r = lstm_re
    wih_i, whh_i, bih_i, bhh_i = lstm_im
    H = wih_r.shape[0] // 4
    wih_rt, wih_it = wih_r.T, wih_i.T                  # (In, 4H)
    whh_rt, whh_it = whh_r.T, whh_i.T                  # (H, 4H)
    b_r = bih_r + bhh_r
    b_i = bih_i + bhh_i
    cols, bias = [], []
    for t in range(4):
        cols.append(wih_rt[:, t * H:(t + 1) * H])
        cols.append(wih_it[:, t * H:(t + 1) * H])
        bias.append(b_r[t * H:(t + 1) * H])
        bias.append(b_i[t * H:(t + 1) * H])
    wih_cat = jnp.concatenate(cols, axis=1)            # (In, 8H)
    bias_cat = jnp.concatenate(bias)                   # (8H,)
    whh_blk = jnp.zeros((2 * H, 8 * H), jnp.float32)   # block-diag recurrent weight
    for t in range(4):
        whh_blk = whh_blk.at[:H, t * 2 * H:t * 2 * H + H].set(whh_rt[:, t * H:(t + 1) * H])
        whh_blk = whh_blk.at[H:, t * 2 * H + H:(t + 1) * 2 * H].set(whh_it[:, t * H:(t + 1) * H])
    return wih_cat, whh_blk, bias_cat


def complex_lstm_layer(x, layer):
    """x: (B, D, T, C) NHWC -> (B, D', T, C) NHWC (complex LSTM + optional proj)."""
    B, D, T, C = x.shape
    Ch = C // 2
    xr = jnp.transpose(x[..., :Ch], (0, 2, 3, 1)).reshape(B, T, Ch * D)
    xi = jnp.transpose(x[..., Ch:], (0, 2, 3, 1)).reshape(B, T, Ch * D)
    stk = jnp.concatenate([xr, xi], axis=0)            # (2B, T, In)
    Bc = 2 * B
    In = Ch * D
    x_seq = jnp.transpose(stk, (1, 0, 2))              # (T, Bc, In)

    H = layer["hidden"]
    G = 8 * H

    # Hoisted input projection: one tiled bf16 MXU matmul (x @ W_ih + bias).
    gx = matmul_bias(x_seq.reshape(T * Bc, In), layer["wih"]).reshape(T, Bc, G)

    TB = min(T, 64)                                    # larger serial time block
    Tp = _round_up(T, TB)
    if Tp != T:
        gx = jnp.pad(gx, ((0, Tp - T), (0, 0), (0, 0)))

    out = pl.pallas_call(
        functools.partial(_lstm_rec_kernel, hidden2=2 * H, tb=TB),
        out_shape=jax.ShapeDtypeStruct((Tp, Bc, 2 * H), jnp.float32),
        grid=(Tp // TB,),
        in_specs=[pl.BlockSpec((TB, Bc, G), lambda t: (t, 0, 0)),
                  pl.BlockSpec((2 * H, G), lambda t: (0, 0))],
        out_specs=pl.BlockSpec((TB, Bc, 2 * H), lambda t: (t, 0, 0)),
        scratch_shapes=[pltpu.VMEM((Bc, 2 * H), jnp.float32),
                        pltpu.VMEM((Bc, 2 * H), jnp.float32)],
        compiler_params=pltpu.CompilerParams(dimension_semantics=("arbitrary",)),
    )(gx, layer["whh"])

    out = jnp.transpose(out[:T], (1, 0, 2))            # (Bc, T, 2H)
    rr, ri = out[:B, :, :H], out[:B, :, H:]            # lstm_re(x_r), lstm_im(x_r)
    ir, ii = out[B:, :, :H], out[B:, :, H:]            # lstm_re(x_i), lstm_im(x_i)

    if layer["fc_r"] is not None:
        # Fused recombination + projection: (rr - ii)@Wr + br, (ir + ri)@Wi + bi.
        BT = B * T
        out_r = complex_matmul_bias(rr.reshape(BT, H), ii.reshape(BT, H),
                                    layer["fc_r"]).reshape(B, T, -1)
        out_i = complex_matmul_bias(ir.reshape(BT, H), ri.reshape(BT, H),
                                    layer["fc_i"]).reshape(B, T, -1)
    else:
        out_r = rr - ii
        out_i = ir + ri

    Fo = out_r.shape[-1]
    D2 = Fo // Ch
    out_r = out_r.reshape(B, T, Ch, D2).transpose(0, 3, 1, 2)   # (B, D2, T, Ch)
    out_i = out_i.reshape(B, T, Ch, D2).transpose(0, 3, 1, 2)
    return jnp.concatenate([out_r, out_i], axis=-1)


# ----------------------------------------------------------------------------
# Parameter init (deterministic, synthetic; packing/padding done once here)
# ----------------------------------------------------------------------------
def _init_conv(key, cout, cin, kh, kw):
    k1, k2 = jax.random.split(key)
    w = jax.random.normal(k1, (cout, cin, kh, kw), jnp.float32) / jnp.sqrt(
        float(cin * kh * kw))
    b = 0.1 * jax.random.normal(k2, (cout,), jnp.float32)
    return w, b


def _init_convT(key, cin, cout, kh, kw):
    k1, k2 = jax.random.split(key)
    w = jax.random.normal(k1, (cin, cout, kh, kw), jnp.float32) / jnp.sqrt(
        float(cin * kh * kw))
    b = 0.1 * jax.random.normal(k2, (cout,), jnp.float32)
    return w, b


def _init_lstm(key, in_size, hidden):
    ks = jax.random.split(key, 4)
    s = 1.0 / jnp.sqrt(float(hidden))
    return (s * jax.random.normal(ks[0], (4 * hidden, in_size), jnp.float32),
            s * jax.random.normal(ks[1], (4 * hidden, hidden), jnp.float32),
            s * jax.random.normal(ks[2], (4 * hidden,), jnp.float32),
            s * jax.random.normal(ks[3], (4 * hidden,), jnp.float32))


def _pad_row(v):
    n = v.shape[0]
    return jnp.pad(v.astype(jnp.float32).reshape(1, n),
                   ((0, 0), (0, _round_up(n, 128) - n)))


def init_dccrn_params(key, n_fft, rnn_layers, rnn_units, kernel_num, kernel_size):
    cnt = [0]

    def nxt():
        cnt[0] += 1
        return jax.random.fold_in(key, cnt[0])

    enc = []
    for i in range(len(kernel_num) - 1):
        cin, cout = kernel_num[i] // 2, kernel_num[i + 1] // 2
        wr, br = _init_conv(nxt(), cout, cin, kernel_size, 2)
        wi, bi = _init_conv(nxt(), cout, cin, kernel_size, 2)
        C = 2 * cout
        enc.append(dict(
            conv=pack_complex_conv(wr, wi, br, bi), cin=cin, cout=cout,
            bn_gamma=_pad_row(1.0 + 0.1 * jax.random.normal(nxt(), (C,), jnp.float32)),
            bn_beta=_pad_row(0.1 * jax.random.normal(nxt(), (C,), jnp.float32)),
            prelu=jnp.full((1, 1), 0.25, jnp.float32)))

    rnn_input_size = n_fft // 2 ** len(kernel_num) * kernel_num[-1]
    rnn = []
    for i in range(rnn_layers):
        in_size = rnn_input_size // 2 if i == 0 else rnn_units // 2
        hidden = rnn_units // 2
        proj = rnn_input_size // 2 if i == rnn_layers - 1 else None
        lstm_re = _init_lstm(nxt(), in_size, hidden)
        lstm_im = _init_lstm(nxt(), in_size, hidden)
        wih_cat, whh_blk, bias_cat = pack_complex_lstm(lstm_re, lstm_im)
        layer = dict(hidden=hidden,
                     wih=pack_dense(wih_cat, bias_cat),
                     whh=whh_blk.astype(jnp.bfloat16))
        if proj is not None:
            kf = jax.random.split(nxt(), 4)
            s = 1.0 / jnp.sqrt(float(hidden))
            Wr = s * jax.random.normal(kf[0], (proj, hidden), jnp.float32)
            br = 0.1 * jax.random.normal(kf[1], (proj,), jnp.float32)
            Wi = s * jax.random.normal(kf[2], (proj, hidden), jnp.float32)
            bi = 0.1 * jax.random.normal(kf[3], (proj,), jnp.float32)
            layer["fc_r"] = pack_two_dense(Wr.T, -Wr.T, br)
            layer["fc_i"] = pack_two_dense(Wi.T, Wi.T, bi)
        else:
            layer["fc_r"] = None
            layer["fc_i"] = None
        rnn.append(layer)

    dec = []
    for i in range(len(kernel_num) - 1, 0, -1):
        cin = kernel_num[i] * 2 // 2
        cout = kernel_num[i - 1] // 2
        wr, br = _init_convT(nxt(), cin, cout, kernel_size, 2)
        wi, bi = _init_convT(nxt(), cin, cout, kernel_size, 2)
        even, odd = pack_complex_convT_phases(wr, wi, br, bi)
        layer = dict(conv_even=even, conv_odd=odd, cin=cin, cout=cout)
        if i != 1:
            C = 2 * cout
            layer.update(
                bn_gamma=_pad_row(1.0 + 0.1 * jax.random.normal(nxt(), (C,), jnp.float32)),
                bn_beta=_pad_row(0.1 * jax.random.normal(nxt(), (C,), jnp.float32)),
                prelu=jnp.full((1, 1), 0.25, jnp.float32))
        else:
            layer.update(bn_gamma=None, bn_beta=None, prelu=None)
        dec.append(layer)

    return dict(encoder=enc, rnn=rnn, decoder=dec)


# ----------------------------------------------------------------------------
# DCCRN forward (channels-last NHWC internally, bf16 HBM transit)
# ----------------------------------------------------------------------------
def dccrn_forward(noisy_spec, params, kernel_size=5):
    # noisy_spec: (B, F, T, 2) is already NHWC with C=2; drop the DC bin.
    out = noisy_spec[:, 1:, :, :].astype(jnp.bfloat16)

    encoder_out = []
    for enc in params["encoder"]:
        slab, (B, Ho, Wo) = complex_conv2d_slab(
            out, enc["conv"], enc["cin"], kernel_size, 2,
            stride=(2, 1), padding=(kernel_size // 2, 1))
        slab = bn_prelu_slab(slab, B * Ho * Wo,
                             enc["bn_gamma"], enc["bn_beta"], enc["prelu"])
        out = slab_to_nhwc(slab, B, Ho, Wo, 2 * enc["cout"])
        encoder_out.append(out)

    for layer in params["rnn"]:
        out = complex_lstm_layer(out, layer)

    for idx, dec in enumerate(params["decoder"]):
        out = skip_connect(out, encoder_out[-1 - idx])
        out = complex_conv_transpose2d_phase(out, dec["conv_even"],
                                             dec["conv_odd"], dec["cin"])
        if dec["bn_gamma"] is not None:
            out = bn_prelu_nhwc(out, dec["bn_gamma"], dec["bn_beta"], dec["prelu"])
        out = out[:, :, 1:, :]                          # drop first time frame

    mask = jnp.pad(out.astype(jnp.float32),
                   ((0, 0), (1, 0), (0, 0), (0, 0)))    # restore DC bin
    return jnp.transpose(mask, (0, 3, 1, 2))            # (B, 2, F, T)


# ----------------------------------------------------------------------------
# Main
# ----------------------------------------------------------------------------
if __name__ == "__main__":
    key = jax.random.PRNGKey(0)
    k_param, k_in = jax.random.split(key)

    # Small but structurally-consistent DCCRN config.
    cfg = dict(n_fft=64, rnn_layers=2, rnn_units=32,
               kernel_num=[2, 8, 16, 16], kernel_size=5)
    params = init_dccrn_params(k_param, **cfg)

    B, T = 2, 8
    F = cfg["n_fft"] // 2 + 1                          # 33 freq bins
    noisy_spec = jax.random.normal(k_in, (B, F, T, 2), dtype=jnp.float32)

    mask = dccrn_forward(noisy_spec, params, kernel_size=cfg["kernel_size"])
    mask = jax.block_until_ready(mask)

    assert mask.shape == (B, 2, F, T), mask.shape
    assert bool(jnp.all(jnp.isfinite(mask)))
    print("KERNEL_OK")
</pallas_src>

<mosaic_0001>
module attributes {stable_mosaic.version = 11 : i64} {
  func.func @_cmm_bias_kernel(%arg0: i32, %arg1: memref<128x128xbf16, #tpu.memory_space<vmem>>, %arg2: memref<128x128xbf16, #tpu.memory_space<vmem>>, %arg3: memref<128x128xbf16, #tpu.memory_space<vmem>>, %arg4: memref<128x128xbf16, #tpu.memory_space<vmem>>, %arg5: memref<1x128xf32, #tpu.memory_space<vmem>>, %arg6: memref<128x128xbf16, #tpu.memory_space<vmem>>) attributes {dimension_semantics = [#tpu.dimension_semantics<parallel>], iteration_bounds = array<i64: 2>, scalar_prefetch = 0 : i64, scratch_operands = 0 : i64, tpu.core_type = #tpu.core_type<tc>, window_params = [{transform_indices = @transform_0, window_bounds = array<i64: 128, 128>}, {transform_indices = @transform_1, window_bounds = array<i64: 128, 128>}, {pipeline_mode = #tpu.pipeline_mode<synchronous>, transform_indices = @transform_2, window_bounds = array<i64: 128, 128>}, {pipeline_mode = #tpu.pipeline_mode<synchronous>, transform_indices = @transform_3, window_bounds = array<i64: 128, 128>}, {pipeline_mode = #tpu.pipeline_mode<synchronous>, transform_indices = @transform_4, window_bounds = array<i64: 1, 128>}, {transform_indices = @transform_5, window_bounds = array<i64: 128, 128>}]} {
    %c0 = arith.constant 0 : index
    %c0_0 = arith.constant 0 : index
    %0 = vector.load %arg1[%c0, %c0_0] : memref<128x128xbf16, #tpu.memory_space<vmem>>, vector<128x128xbf16>
    %c0_1 = arith.constant 0 : index
    %c0_2 = arith.constant 0 : index
    %1 = vector.load %arg3[%c0_1, %c0_2] : memref<128x128xbf16, #tpu.memory_space<vmem>>, vector<128x128xbf16>
    %cst = arith.constant dense<0.000000e+00> : vector<128x128xf32>
    %2 = tpu.matmul %0, %1, %cst {dimension_numbers = #tpu.dot_dimension_numbers<[1], [0], [0], [1], [0, 0, 1, 1], [], []>} : vector<128x128xbf16>, vector<128x128xbf16>, vector<128x128xf32> -> vector<128x128xf32>
    %c0_3 = arith.constant 0 : index
    %c0_4 = arith.constant 0 : index
    %3 = vector.load %arg2[%c0_3, %c0_4] : memref<128x128xbf16, #tpu.memory_space<vmem>>, vector<128x128xbf16>
    %c0_5 = arith.constant 0 : index
    %c0_6 = arith.constant 0 : index
    %4 = vector.load %arg4[%c0_5, %c0_6] : memref<128x128xbf16, #tpu.memory_space<vmem>>, vector<128x128xbf16>
    %cst_7 = arith.constant dense<0.000000e+00> : vector<128x128xf32>
    %5 = tpu.matmul %3, %4, %cst_7 {dimension_numbers = #tpu.dot_dimension_numbers<[1], [0], [0], [1], [0, 0, 1, 1], [], []>} : vector<128x128xbf16>, vector<128x128xbf16>, vector<128x128xf32> -> vector<128x128xf32>
    %6 = arith.addf %2, %5 : vector<128x128xf32>
    %c0_8 = arith.constant 0 : index
    %c0_9 = arith.constant 0 : index
    %7 = vector.load %arg5[%c0_8, %c0_9] : memref<1x128xf32, #tpu.memory_space<vmem>>, vector<1x128xf32>
    %8 = vector.broadcast %7 : vector<1x128xf32> to vector<128x128xf32>
    %9 = arith.addf %6, %8 : vector<128x128xf32>
    %10 = arith.truncf %9 : vector<128x128xf32> to vector<128x128xbf16>
    %c0_10 = arith.constant 0 : index
    %c0_11 = arith.constant 0 : index
    %11 = vector.load %arg6[%c0_10, %c0_11] : memref<128x128xbf16, #tpu.memory_space<vmem>>, vector<128x128xbf16>
    tpu.vector_store %arg6[%c0_10, %c0_11], %10 {strides = array<i32>} : memref<128x128xbf16, #tpu.memory_space<vmem>>, vector<128x128xbf16>,
    return
  }
  func.func @transform_0(%arg0: i32) -> (i32, i32) {
    %c0_i32 = arith.constant 0 : i32
    %c0_i32_0 = arith.constant 0 : i32
    return %arg0, %c0_i32 : i32, i32
  }
  func.func @transform_1(%arg0: i32) -> (i32, i32) {
    %c0_i32 = arith.constant 0 : i32
    %c0_i32_0 = arith.constant 0 : i32
    return %arg0, %c0_i32 : i32, i32
  }
  func.func @transform_2(%arg0: i32) -> (i32, i32) {
    %c0_i32 = arith.constant 0 : i32
    %c0_i32_0 = arith.constant 0 : i32
    %c0_i32_1 = arith.constant 0 : i32
    return %c0_i32, %c0_i32_0 : i32, i32
  }
  func.func @transform_3(%arg0: i32) -> (i32, i32) {
    %c0_i32 = arith.constant 0 : i32
    %c0_i32_0 = arith.constant 0 : i32
    %c0_i32_1 = arith.constant 0 : i32
    return %c0_i32, %c0_i32_0 : i32, i32
  }
  func.func @transform_4(%arg0: i32) -> (i32, i32) {
    %c0_i32 = arith.constant 0 : i32
    %c0_i32_0 = arith.constant 0 : i32
    %c0_i32_1 = arith.constant 0 : i32
    return %c0_i32, %c0_i32_0 : i32, i32
  }
  func.func @transform_5(%arg0: i32) -> (i32, i32) {
    %c0_i32 = arith.constant 0 : i32
    %c0_i32_0 = arith.constant 0 : i32
    return %arg0, %c0_i32 : i32, i32
  }
}

</mosaic_0001>

<bundles_post_ra>
// kernel: tpu_custom_call.1
= control target key start
LH: loop header
LB: loop body
LE: loop exit
PB: predicated region body
PF: predicated region fallthrough
CT: control target
= control target key end

     0   :  { %s1662_s0 = inlined_call_operand.hbm [shape: bf16[256,128], index: 0, kind: input, shape index: {}]   ;;  %s1663_s1 = inlined_call_operand.hbm [shape: bf16[256,128], index: 1, kind: input, shape index: {}]   ;;  %s1664_s2 = inlined_call_operand.hbm [shape: bf16[128,128], index: 2, kind: input, shape index: {}]   ;;  %s1665_s3 = inlined_call_operand.hbm [shape: bf16[128,128], index: 3, kind: input, shape index: {}]   ;;  %s1666_s4 = inlined_call_operand.vmem [shape: f32[1,128], index: 4, kind: input, shape index: {}]   ;;  %s1667_s5 = inlined_call_operand.hbm [shape: bf16[256,128], index: 5, kind: output, shape index: {}]  }
   0x1   :  { %1672 = sst [smem:[#allocation17_spill]] %s1662_s0 }
   0x2   :  { %1673 = sst [smem:[#allocation18_spill]] %s1664_s2 }
   0x3   :  { %1674 = sst [smem:[#allocation19_spill]] %s1665_s3 }
   0x4   :  { %10 = vsyncpa [#allocation3], 0 }
   0x5   :  { %12 = vsyncpa [#allocation3 + $0x1], 0 }
   0x6   :  { %13 = vsyncpa [#allocation6], 0 }
   0x7   :  { %15 = vsyncpa [#allocation6 + $0x1], 0 }
   0x8   :  { %16 = vsyncpa [#allocation9], 0 }
   0x9   :  { %17 = vsyncpa [#allocation4], 0 }
   0xa   :  { %19 = vsyncpa [#allocation4 + $0x1], 0  ;;  %s1421_s18 = smov 0   ;;  %s1423_s19 = smov 0  }
   0xb   :  { %s1425_s20 = smov 0   ;;  %s1427_s21 = smov 0  }
   0xc LB: > { %s1442_s22 = sadd.s32 4294967295, %s1383_s21   ;;  %s860_s23 = sadd.s32 4294967294, %s1383_s21   ;;  %s1383_s21 = sphi %s1427_s21, %s1691_s21   ;;  %s1379_s20 = sphi %s1425_s20, %s1690_s20   ;;  %s1375_s19 = sphi %s1423_s19, %s1689_s19   ;;  %s1371_s18 = sphi %s1421_s18, %s1688_s18  }
   0xd   : > { %p45_p0 = scmp.ne.s32.totalorder %s1375_s19, %s1371_s18  ;;  %p46_p1 = scmp.eq.s32.totalorder %s1442_s22, 0 }
   0xe   : > { %p158_p2 = scmp.eq.s32.totalorder %s1442_s22, 1  ;;  %p164_p3 = scmp.eq.s32.totalorder %s860_s23, 1 }
   0xf   : > { %p1451_p4 = por %p46_p1, %p45_p0  ;;  %p861_p5 = scmp.ge.s32.totalorder %s1383_s21, 1 }
  0x10   : > { %p1456_p6 = por %p164_p3, %p45_p0  ;;  %p171_p7 = scmp.lt.s32.totalorder %s1383_s21, 3 }
  0x11   : > { %s1677_s2 = sld [smem:[#allocation18_spill]]  ;;  %s1385_s30 = smov [#allocation7]  }
  0x12   : > { %p1464_p8 = pnand %p861_p5, %p171_p7  ;;  %s184_s6 = sshll.u32 %s1385_s30, 4  ;;  %s185_s6 = int_to_ptr.vmem [resolvable:$true] %s184_s6 }
  0x13   : > { %s1679_s3 = sld [smem:[#allocation19_spill]]  ;;  %s1668_s10 = smov 64  }
  0x14   : > { %p1122_p9 = pneg %p1464_p8  ;;  %s1670_s11 = smov 4  }
  0x15   : > { %s1388_s12 = smov [#allocation8]   ;;  %s1483_s14 = sadd.s32 1, %s1383_s21  }
  0x16   : > { %p1123_p10 = pnand %p1122_p9, %p46_p1  ;;  %s198_s13 = sshll.u32 %s1388_s12, 4  ;;  %s199_s13 = int_to_ptr.vmem [resolvable:$true] %s198_s13 }
  0x17   : > { %s182_s28 = sshll.u32 %s1677_s2, 4  ;;  %s32_s15 = sadd.s32 1, %s1379_s20  ;;  %s183_s28 = int_to_ptr.hbm [resolvable:$true] %s182_s28 }
  0x18   : > { %1125 = dma.hbm_to_vmem [thread:$0]  (!%p1123_p10), %s183_s28, 1024, %s185_s6, [#allocation6], %s1668_s10, %s1668_s10, %s1670_s11  }
  0x19   : > { %s196_s9 = sshll.u32 %s1679_s3, 4  ;;  %s29_s16 = ssub.s32 %s1383_s21, %s1483_s14  ;;  %s197_s9 = int_to_ptr.hbm [resolvable:$true] %s196_s9 }
  0x1a   : > { %1128 = dma.hbm_to_vmem [thread:$0]  (!%p1123_p10), %s197_s9, 1024, %s199_s13, [#allocation9], %s1668_s10, %s1668_s10, %s1670_s11  }
  0x1b   : > { %p39_p12 = scmp.ne.s32.totalorder %s1379_s20, %s1375_s19  ;;  %p30_p13 = scmp.eq.s32.totalorder %s29_s16, 0 }
  0x1c   : > { %p40_p0 = scmp.eq.s32.totalorder %s1383_s21, 0  ;;  %p1142_p5 = scmp.lt.s32.totalorder %s1383_s21, 2 }
  0x1d   : > { %p1493_p3 = por %p158_p2, %p39_p12  ;;  %s215_s26 = sand.u32 1, %s1379_s20  }
  0x1e   : > { %s1499_s23 = scalar_select %p30_p13, %s1379_s20, %s32_s15  }
  0x1f   : > { %p41_p7 = por %p40_p0, %p39_p12  ;;  %s1502_s27 = sshll.u32 %s215_s26, 6 }
  0x20   : > { %1681 = sst [smem:[#allocation16_spill]] %s1499_s23  ;;  %s1010_s28 = sshll.u32 %s1383_s21, 6 }
  0x21   : > { %s1682_s0 = sld [smem:[#allocation17_spill]]  ;;  %s219_s8 = scalar_lea.vmem [#allocation2], %s1502_s27 }
  0x22   : > { %s227_s9 = sshll.u32 %s219_s8, 4  ;;  %p1509_p2 = pnand %p1142_p5, %p41_p7  ;;  %s228_s9 = int_to_ptr.vmem [resolvable:$true] %s227_s9 }
  0x23   : > { %s246_s10 = scalar_lea.hbm %s1663_s1, %s1010_s28  ;;  %s216_s2 = scalar_lea.sflag [#allocation3], %s215_s26 }
  0x24   : > { %s247_s11 = sshll.u32 %s246_s10, 4  ;;  %p1249_p10 = pneg %p1509_p2  ;;  %s248_s11 = int_to_ptr.hbm [resolvable:$true] %s247_s11 }
  0x27   : > { %s224_s7 = scalar_lea.hbm %s1682_s0, %s1010_s28  ;;  %s1252_s8 = scalar_lea.hbm %s1682_s0, 128 }
  0x28   : > { %s225_s12 = sshll.u32 %s224_s7, 4  ;;  %s226_s12 = int_to_ptr.hbm [resolvable:$true] %s225_s12 }
  0x29   : > { %s1245_s3 = sshra.s32 %s226_s12, 4  ;;  %s1246_s3 = int_to_ptr.hbm [resolvable:$true] %s1245_s3 }
  0x2a   : > { %s1247_s30 = scalar_lea.hbm %s1246_s3, 64  ;;  %p1253_p0 = scmp.lt.s32.totalorder %s1246_s3, %s1682_s0 }
  0x2b   : > { %p1248_p9 = scmp.ne.s32.totalorder %s1246_s3, %s1247_s30  ;;  %p1254_p5 = scmp.lt.s32.totalorder %s1252_s8, %s1247_s30 }
  0x2d   : > { %p1250_p12 = pnand %p1249_p10, %p1248_p9  ;;  %p1255_p7 = por %p1254_p5, %p1253_p0 }
  0x2f   : > { %p1251_p13 = pneg %p1250_p12 }
  0x31   : > { %p1256_p11 = pnand %p1255_p7, %p1251_p13 }
  0x33   : > { %1259 = shalt.err (!%p1256_p11)
}
  0x34   : > { %s1684_s10 = smov 4   ;;  %s1685_s26 = smov 64  }
  0x35   : > { %1132 = dma.hbm_to_vmem [thread:$0]  (!%p1509_p2), %s226_s12, 1024, %s228_s9, %s216_s2, %s1685_s26, %s1685_s26, %s1684_s10  }
  0x36   : > { %s241_s28 = scalar_lea.vmem [#allocation5], %s1502_s27  ;;  %s237_s7 = sand.u32 1, %s1383_s21  }
  0x37   : > { %s249_s6 = sshll.u32 %s241_s28, 4  ;;  %s238_s15 = scalar_lea.sflag [#allocation6], %s237_s7  ;;  %s250_s6 = int_to_ptr.vmem [resolvable:$true] %s249_s6 }
  0x38   : > { %s1275_s3 = sshra.s32 %s248_s11, 4  ;;  %s1282_s0 = scalar_lea.hbm %s1663_s1, 128  ;;  %s1276_s3 = int_to_ptr.hbm [resolvable:$true] %s1275_s3 }
  0x39   : > { %s1277_s30 = scalar_lea.hbm %s1276_s3, 64  ;;  %p1283_p13 = scmp.lt.s32.totalorder %s1276_s3, %s1663_s1 }
  0x3a   : > { %p1278_p9 = scmp.ne.s32.totalorder %s1276_s3, %s1277_s30  ;;  %p1284_p0 = scmp.lt.s32.totalorder %s1282_s0, %s1277_s30 }
  0x3c   : > { %p1280_p11 = pnand %p1278_p9, %p1249_p10  ;;  %p1285_p5 = por %p1284_p0, %p1283_p13 }
  0x3e   : > { %p1281_p12 = pneg %p1280_p11 }
  0x40   : > { %p1286_p7 = pnand %p1285_p5, %p1281_p12 }
  0x42   : > { %1289 = shalt.err (!%p1286_p7)
}
  0x43   : > { %1135 = dma.hbm_to_vmem [thread:$0]  (!%p1509_p2), %s248_s11, 1024, %s250_s6, %s238_s15, %s1685_s26, %s1685_s26, %s1684_s10  }
  0x44   : > { %261 = sbr.rel (%p1464_p8) target bundleno = 312 (0x138), region = 40  ;;  %s1551_s27 = sand.u32 (!%p1464_p8), 1, %s1375_s19  }
  0x45   : > { %s1554_s23 = sshll.u32 (!%p1464_p8), %s1551_s27, 6  ;;  %s264_s0 = scalar_lea.sflag (!%p1464_p8), [#allocation3], %s1551_s27 }
  0x46   : > { %s1558_s9 = scalar_lea.vmem (!%p1464_p8), [#allocation2], %s1554_s23 }
  0x49   : > { %1350 = dma.done.wait (%p1451_p4), %s264_s0, 1024  }
  0x4a   : > { %1352 = vsyncadd (%p1451_p4), %s264_s0, 4294966272  ;;  %s273_s29 = sand.u32 1, %s1442_s22   ;;  %s1566_s12 = scalar_lea.vmem [#allocation5], %s1554_s23 }
  0x4b   : > { %s274_s11 = scalar_lea.sflag [#allocation6], %s273_s29 }
  0x4c   : > { %1354 = dma.done.wait (%p1451_p4), %s274_s11, 1024  }
  0x4d   : > { %1356 = vsyncadd (%p1451_p4), %s274_s11, 4294966272 }
  0x4e   : > { %1358 = dma.done.wait (%p46_p1), [#allocation6], 1024  }
  0x4f   : > { %1360 = vsyncadd (%p46_p1), [#allocation6], 4294966272 }
  0x50   : > { %1362 = dma.done.wait (%p46_p1), [#allocation9], 1024  }
  0x51   : > { %1364 = vsyncadd (%p46_p1), [#allocation9], 4294966272  ;;  %v1043_v0 = vld [vmem:[#allocation8 + $0x38] sm:$0xff]  ;;  %v1042_v2 = vld [vmem:[#allocation8 + $0x30] sm:$0xff]  ;;  %s1604_s10 = scalar_lea.vmem [#allocation10], %s1554_s23  ;;  %s1044_s26 = sshll.u32 %s1442_s22, 6 }
  0x52   : > { %v1027_v1 = vld [vmem:[#allocation7 + $0x38] sm:$0xff]  ;;  %483 = vmatpush.bf16.msra.mxu0 %v1043_v0  ;;  %1092 = vmatpush.bf16.msra.mxu2 %v1043_v0  ;;  %v1026_v3 = vld [vmem:[#allocation7 + $0x30] sm:$0xff]  ;;  %v1041_v4 = vld [vmem:[#allocation8 + $0x28] sm:$0xff]  ;;  %s741_s7 = scalar_lea.hbm %s1667_s5, %s1044_s26  ;;  %s742_s15 = sshll.u32 %s1604_s10, 4  ;;  %s743_s15 = int_to_ptr.vmem [resolvable:$true] %s742_s15 }
  0x53   : > { %628 = vmatpush.bf16.msra.mxu1 %v1027_v1  ;;  %1100 = vmatpush.bf16.msra.mxu3 %v1027_v1  ;;  %v1025_v5 = vld [vmem:[#allocation7 + $0x28] sm:$0xff]  ;;  %v1040_v6 = vld [vmem:[#allocation8 + $0x20] sm:$0xff]  ;;  %v1039_v8 = vld [vmem:[#allocation8 + $0x18] sm:$0xff]  ;;  %s744_s3 = sshll.u32 %s741_s7, 4  ;;  %s730_s22 = scalar_lea.sflag [#allocation4], %s1551_s27  ;;  %s745_s3 = int_to_ptr.hbm [resolvable:$true] %s744_s3 }
  0x54   : > { %v1024_v7 = vld [vmem:[#allocation7 + $0x20] sm:$0xff]  ;;  %v1023_v9 = vld [vmem:[#allocation7 + $0x18] sm:$0xff]  ;;  %v1038_v10 = vld [vmem:[#allocation8 + $0x10] sm:$0xff]  ;;  %s1319_s30 = sshra.s32 %s745_s3, 4  ;;  %s1325_s23 = scalar_lea.hbm %s1667_s5, 128  ;;  %s1320_s30 = int_to_ptr.hbm [resolvable:$true] %s1319_s30 }
  0x55   : > { %v1022_v11 = vld [vmem:[#allocation7 + $0x10] sm:$0xff]  ;;  %v1037_v12 = vld [vmem:[#allocation8 + $0x8] sm:$0xff]  ;;  %v1036_v14 = vld [vmem:[#allocation8] sm:$0xff]  ;;  %s1321_s8 = scalar_lea.hbm %s1320_s30, 64  ;;  %p1326_p2 = scmp.lt.s32.totalorder %s1320_s30, %s1667_s5 }
  0x56   : > { %484 = vmatpush.bf16.msra.mxu0 %v1042_v2  ;;  %1093 = vmatpush.bf16.msra.mxu2 %v1042_v2  ;;  %v1021_v13 = vld [vmem:[#allocation7 + $0x8] sm:$0xff]  ;;  %v1020_v15 = vld [vmem:[#allocation7] sm:$0xff]  ;;  %v1030_v24 = vld [vmem:[%s1566_s12 + $0x10] sm:$0xff]  ;;  %p1322_p1 = scmp.ne.s32.totalorder %s1320_s30, %s1321_s8  ;;  %p1327_p10 = scmp.lt.s32.totalorder %s1325_s23, %s1321_s8 }
  0x57   : > { %629 = vmatpush.bf16.msra.mxu1 %v1026_v3  ;;  %1101 = vmatpush.bf16.msra.mxu3 %v1026_v3  ;;  %v1028_v16 = vld [vmem:[%s1566_s12] sm:$0xff]  ;;  %v1029_v20 = vld [vmem:[%s1566_s12 + $0x8] sm:$0xff]  ;;  %v1034_v25 = vld [vmem:[%s1566_s12 + $0x30] sm:$0xff] }
  0x58   : > { %v1032_v17 = vld [vmem:[%s1566_s12 + $0x20] sm:$0xff]  ;;  %v1033_v21 = vld [vmem:[%s1566_s12 + $0x28] sm:$0xff]  ;;  %v1014_v26 = vld [vmem:[%s1558_s9 + $0x10] sm:$0xff]  ;;  %p1323_p4 = pnand %p1322_p1, %p1493_p3  ;;  %p1328_p9 = por %p1327_p10, %p1326_p2 }
  0x59   : > { %v1012_v18 = vld [vmem:[%s1558_s9] sm:$0xff]  ;;  %v1013_v22 = vld [vmem:[%s1558_s9 + $0x8] sm:$0xff]  ;;  %v1018_v27 = vld [vmem:[%s1558_s9 + $0x30] sm:$0xff] }
  0x5a   : > { %485 = vmatpush.bf16.msra.mxu0 %v1041_v4  ;;  %1094 = vmatpush.bf16.msra.mxu2 %v1041_v4  ;;  %v1016_v19 = vld [vmem:[%s1558_s9 + $0x20] sm:$0xff]  ;;  %v1017_v23 = vld [vmem:[%s1558_s9 + $0x28] sm:$0xff]  ;;  %v1031_v28 = vld [vmem:[%s1566_s12 + $0x18] sm:$0xff]  ;;  %p1324_p8 = pneg %p1323_p4 }
  0x5b   : > { %630 = vmatpush.bf16.msra.mxu1 %v1025_v5  ;;  %1102 = vmatpush.bf16.msra.mxu3 %v1025_v5  ;;  %v1035_v29 = vld [vmem:[%s1566_s12 + $0x38] sm:$0xff]  ;;  %v1599_v37 = vld [vmem:[%s1666_s4] ss:$0 sm:$0xff] }
  0x5c   : > { %v1015_v30 = vld [vmem:[%s1558_s9 + $0x18] sm:$0xff]  ;;  %p1329_p11 = pnand %p1328_p9, %p1324_p8 }
  0x5d   : > { %v1019_v31 = vld [vmem:[%s1558_s9 + $0x38] sm:$0xff] }
  0x5e   : > { %486 = vmatpush.bf16.msra.mxu0 %v1040_v6  ;;  %1095 = vmatpush.bf16.msra.mxu2 %v1040_v6 }
  0x5f   : > { %631 = vmatpush.bf16.msra.mxu1 %v1024_v7  ;;  %1103 = vmatpush.bf16.msra.mxu3 %v1024_v7 }
  0x62   : > { %487 = vmatpush.bf16.msra.mxu0 %v1039_v8  ;;  %1096 = vmatpush.bf16.msra.mxu2 %v1039_v8 }
  0x63   : > { %632 = vmatpush.bf16.msra.mxu1 %v1023_v9  ;;  %1104 = vmatpush.bf16.msra.mxu3 %v1023_v9 }
  0x66   : > { %488 = vmatpush.bf16.msra.mxu0 %v1038_v10  ;;  %1097 = vmatpush.bf16.msra.mxu2 %v1038_v10 }
  0x67   : > { %633 = vmatpush.bf16.msra.mxu1 %v1022_v11  ;;  %1105 = vmatpush.bf16.msra.mxu3 %v1022_v11 }
  0x6a   : > { %489 = vmatpush.bf16.msra.mxu0 %v1037_v12  ;;  %1098 = vmatpush.bf16.msra.mxu2 %v1037_v12 }
  0x6b   : > { %634 = vmatpush.bf16.msra.mxu1 %v1021_v13  ;;  %1106 = vmatpush.bf16.msra.mxu3 %v1021_v13 }
  0x6e   : > { %490 = vmatpush.bf16.msra.mxu0 %v1036_v14  ;;  %1099 = vmatpush.bf16.msra.mxu2 %v1036_v14 }
  0x6f   : > { %635 = vmatpush.bf16.msra.mxu1 %v1020_v15  ;;  %1107 = vmatpush.bf16.msra.mxu3 %v1020_v15 }
  0x71   : > { %491 = vmatmul.bf16.vlgmr.msra.gmra.mxu0 %v1028_v16  ;;  %511 = vmatmul.bf16.vlgmr.msra.gmra.mxu2 %v1032_v17 }
  0x72   : > { %636 = vmatmul.bf16.vlgmr.msra.gmra.mxu1 %v1012_v18  ;;  %656 = vmatmul.bf16.vlgmr.msra.gmra.mxu3 %v1016_v19 }
  0x81   : > { %496 = vmatmul.bf16.gmra.mxu0 %v1029_v20  ;;  %516 = vmatmul.bf16.gmra.mxu2 %v1033_v21 }
  0x82   : > { %641 = vmatmul.bf16.gmra.mxu1 %v1013_v22  ;;  %661 = vmatmul.bf16.gmra.mxu3 %v1017_v23 }
  0x91   : > { %501 = vmatmul.bf16.gmra.mxu0 %v1030_v24  ;;  %521 = vmatmul.bf16.gmra.mxu2 %v1034_v25 }
  0x92   : > { %646 = vmatmul.bf16.gmra.mxu1 %v1014_v26  ;;  %666 = vmatmul.bf16.gmra.mxu3 %v1018_v27 }
  0xa1   : > { %506 = vmatmul.bf16.gmra.mxu0 %v1031_v28  ;;  %526 = vmatmul.bf16.gmra.mxu2 %v1035_v29 }
  0xa2   : > { %651 = vmatmul.bf16.gmra.mxu1 %v1015_v30  ;;  %671 = vmatmul.bf16.gmra.mxu3 %v1019_v31 }
  0xee   : > { %v492_v32 = vpop.f32.mrf.mxu0 }
  0xef   : > { %v637_v33 = vpop.f32.mrf.mxu1 }
  0xf0   : > { %v638_v36 = vadd.f32 %v637_v33, %v492_v32 }
  0xf2   : > { %v681_v41 = vadd.f32 %v1599_v37, %v638_v36 }
  0xf4   : > { %v512_v34 = vpop.f32.mrf.mxu2 }
  0xf5   : > { %v657_v35 = vpop.f32.mrf.mxu3 }
  0xf6   : > { %v494_v38 = vpop.f32.mrf.mxu0  ;;  %v658_v43 = vadd.f32 %v657_v35, %v512_v34 }
  0xf7   : > { %v639_v39 = vpop.f32.mrf.mxu1 }
  0xf8   : > { %v640_v40 = vadd.f32 %v639_v39, %v494_v38  ;;  %v689_v50 = vadd.f32 %v1599_v37, %v658_v43 }
  0xfa   : > { %v682_v42 = vadd.f32 %v1599_v37, %v640_v40 }
  0xfc   : > { %v1048_v44 = vpack.c.bf16 %v682_v42, %v681_v41  ;;  %v514_v45 = vpop.f32.mrf.mxu2 }
  0xfd   : > { %v659_v46 = vpop.f32.mrf.mxu3 }
  0xfe   : > { %1049 = vst [vmem:[%s1604_s10] sm:$0xff] %v1048_v44   ;;  %v660_v47 = vadd.f32 %v659_v46, %v514_v45  ;;  %v497_v48 = vpop.f32.mrf.mxu0 }
  0xff   : > { %v642_v49 = vpop.f32.mrf.mxu1 }
 0x100   : > { %v690_v51 = vadd.f32 %v1599_v37, %v660_v47  ;;  %v643_v55 = vadd.f32 %v642_v49, %v497_v48 }
 0x102   : > { %v1068_v52 = vpack.c.bf16 %v690_v51, %v689_v50  ;;  %v683_v59 = vadd.f32 %v1599_v37, %v643_v55 }
 0x104   : > { %1088 = vst [vmem:[%s1604_s10 + $0x20] sm:$0xff] %v1068_v52   ;;  %v517_v53 = vpop.f32.mrf.mxu2 }
 0x105   : > { %v662_v54 = vpop.f32.mrf.mxu3 }
 0x106   : > { %v499_v56 = vpop.f32.mrf.mxu0  ;;  %v663_v61 = vadd.f32 %v662_v54, %v517_v53 }
 0x107   : > { %v644_v57 = vpop.f32.mrf.mxu1 }
 0x108   : > { %v645_v58 = vadd.f32 %v644_v57, %v499_v56  ;;  %v691_v4 = vadd.f32 %v1599_v37, %v663_v61 }
 0x10a   : > { %v684_v60 = vadd.f32 %v1599_v37, %v645_v58 }
 0x10c   : > { %v1053_v62 = vpack.c.bf16 %v684_v60, %v683_v59  ;;  %v519_v63 = vpop.f32.mrf.mxu2 }
 0x10d   : > { %v664_v0 = vpop.f32.mrf.mxu3 }
 0x10e   : > { %1085 = vst [vmem:[%s1604_s10 + $0x8] sm:$0xff] %v1053_v62   ;;  %v665_v1 = vadd.f32 %v664_v0, %v519_v63  ;;  %v502_v2 = vpop.f32.mrf.mxu0 }
 0x10f   : > { %v647_v3 = vpop.f32.mrf.mxu1 }
 0x110   : > { %v692_v5 = vadd.f32 %v1599_v37, %v665_v1  ;;  %v648_v9 = vadd.f32 %v647_v3, %v502_v2 }
 0x112   : > { %v1073_v6 = vpack.c.bf16 %v692_v5, %v691_v4  ;;  %v685_v13 = vadd.f32 %v1599_v37, %v648_v9 }
 0x114   : > { %1089 = vst [vmem:[%s1604_s10 + $0x28] sm:$0xff] %v1073_v6   ;;  %v522_v7 = vpop.f32.mrf.mxu2 }
 0x115   : > { %v667_v8 = vpop.f32.mrf.mxu3 }
 0x116   : > { %v504_v10 = vpop.f32.mrf.mxu0  ;;  %v668_v15 = vadd.f32 %v667_v8, %v522_v7 }
 0x117   : > { %v649_v11 = vpop.f32.mrf.mxu1 }
 0x118   : > { %v650_v12 = vadd.f32 %v649_v11, %v504_v10  ;;  %v693_v22 = vadd.f32 %v1599_v37, %v668_v15 }
 0x11a   : > { %v686_v14 = vadd.f32 %v1599_v37, %v650_v12 }
 0x11c   : > { %v1058_v16 = vpack.c.bf16 %v686_v14, %v685_v13  ;;  %v524_v17 = vpop.f32.mrf.mxu2 }
 0x11d   : > { %v669_v18 = vpop.f32.mrf.mxu3 }
 0x11e   : > { %1086 = vst [vmem:[%s1604_s10 + $0x10] sm:$0xff] %v1058_v16   ;;  %v670_v19 = vadd.f32 %v669_v18, %v524_v17  ;;  %v507_v20 = vpop.f32.mrf.mxu0 }
 0x11f   : > { %v652_v21 = vpop.f32.mrf.mxu1 }
 0x120   : > { %v694_v23 = vadd.f32 %v1599_v37, %v670_v19  ;;  %v653_v27 = vadd.f32 %v652_v21, %v507_v20 }
 0x122   : > { %v1078_v24 = vpack.c.bf16 %v694_v23, %v693_v22  ;;  %v687_v31 = vadd.f32 %v1599_v37, %v653_v27 }
 0x124   : > { %1090 = vst [vmem:[%s1604_s10 + $0x30] sm:$0xff] %v1078_v24   ;;  %v527_v25 = vpop.f32.mrf.mxu2 }
 0x125   : > { %v672_v26 = vpop.f32.mrf.mxu3 }
 0x126   : > { %v509_v28 = vpop.f32.mrf.mxu0  ;;  %v673_v33 = vadd.f32 %v672_v26, %v527_v25 }
 0x127   : > { %v654_v29 = vpop.f32.mrf.mxu1 }
 0x128   : > { %v655_v30 = vadd.f32 %v654_v29, %v509_v28  ;;  %v695_v39 = vadd.f32 %v1599_v37, %v673_v33 }
 0x12a   : > { %v688_v32 = vadd.f32 %v1599_v37, %v655_v30 }
 0x12c   : > { %v1063_v34 = vpack.c.bf16 %v688_v32, %v687_v31  ;;  %v529_v35 = vpop.f32.mrf.mxu2 }
 0x12d   : > { %v674_v36 = vpop.f32.mrf.mxu3 }
 0x12e   : > { %1087 = vst [vmem:[%s1604_s10 + $0x18] sm:$0xff] %v1063_v34   ;;  %v675_v38 = vadd.f32 %v674_v36, %v529_v35 }
 0x130   : > { %v696_v40 = vadd.f32 %v1599_v37, %v675_v38 }
 0x132   : > { %v1083_v41 = vpack.c.bf16 %v696_v40, %v695_v39 }
 0x134   : > { %1091 = vst [vmem:[%s1604_s10 + $0x38] sm:$0xff] %v1083_v41  }
 0x135   : > { %1332 = shalt.err (!%p1329_p11)
}
 0x136   : > { %s1389_s27 = smov 64   ;;  %s1390_s29 = smov 4  }
 0x137   : > { %1120 = dma.vmem_to_hbm [thread:$0]  (%p1493_p3), %s743_s15, 1024, %s745_s3, %s730_s22, %s1389_s27, %s1389_s27, %s1390_s29  }
 0x138 PF: > { %s759_s11 = sand.u32 1, %s1371_s18   ;;  %p1686_p12 = scmp.ge.s32.totalorder %s1383_s21, 2 }
 0x139   : > { %s760_s12 = scalar_lea.sflag [#allocation4], %s759_s11 }
 0x13a   : > { %p1137_p13 = pnand %p1686_p12, %p1456_p6 }
 0x13c   : > { %p1138_p0 = pneg %p1137_p13 }
 0x13e   : > { %1366 = dma.done.wait (%p1138_p0), %s760_s12, 1024  }
 0x13f   : > { %1368 = vsyncadd (%p1138_p0), %s760_s12, 4294966272  ;;  %s1687_s24 = sld [smem:[#allocation16_spill]]  ;;  %p22_p5 = scmp.ge.s32.totalorder %s1483_s14, 4  }
 0x140   : > { %s1688_s18 = smov %s1375_s19  ;;  %s1689_s19 = smov %s1379_s20 }
 0x141   : > { %s1691_s21 = smov %s1483_s14  ;;  %24 = sbr.rel (!%p22_p5) target bundleno = 12 (0xc), region = 106 }
 0x145   : > { %s1690_s20 = smov %s1687_s24 }
 0x146   :  { %766 = vsyncpa [#allocation3], 1 }
 0x147   :  { %768 = vsyncpa [#allocation3 + $0x1], 1 }
 0x148   :  { %769 = vsyncpa [#allocation6], 1 }
 0x149   :  { %771 = vsyncpa [#allocation6 + $0x1], 1 }
 0x14a   :  { %772 = vsyncpa [#allocation9], 1 }
 0x14b   :  { %773 = vsyncpa [#allocation4], 1 }
 0x14c   :  { %775 = vsyncpa [#allocation4 + $0x1], 1 }

</bundles_post_ra>
